<compile_context>
chip_gen: v5e
topology: v5e:2x2
jax: 0.10.0
libtpu: 0.0.40
codegen_flags: <defaults>
</compile_context>

<pallas_src>
import jax
import jax.numpy as jnp
from jax.experimental import pallas as pl
from jax.experimental.pallas import tpu as pltpu

OUT_C = 1000
KSIZE = 8
IN_C = 5
CK = IN_C * KSIZE      # 40
BN_EPS = 1e-5
BB_MAX = 512           # max batch rows per grid step


def freqnet_kernel(mp_ref, w_ref, shift_ref, lin_ref, o_ref):
    # mp_ref:    (BB, CK)     per-batch window-means of the input patches
    # w_ref:     (CK, OUT_C)  reshaped conv weight with BN scale pre-folded
    # shift_ref: (1, OUT_C)   conv bias + BN shift (post-mean affine)
    # lin_ref:   (2,) SMEM    [Linear(1,1).weight, Linear(1,1).bias]
    # o_ref:     (BB, OUT_C)
    pooled = jnp.dot(mp_ref[...], w_ref[...],
                     preferred_element_type=jnp.float32)      # (BB, OUT_C)
    y = pooled + shift_ref[...]                                # conv bias + BN (eval), hoisted after mean
    r = jnp.maximum(y, 0.0)                                    # ReLU (Dropout1d identity in eval)
    z = r * lin_ref[0] + lin_ref[1]                            # Linear(1,1) on size-1 last dim
    # sigmoid(z) = 0.5*tanh(z/2)+0.5 : transcendental on EUP, no VALU divide
    o_ref[...] = 0.5 * jnp.tanh(0.5 * z) + 0.5


def window_means(x, k):
    # x: (B, C, L) -> (B, C*k); entry (b, c*k+j) = mean_t x[b, c, t+j], t in [0, T)
    # single cumsum pass over x (one HBM read of x instead of up to k).
    B, C, L = x.shape
    T = L - k + 1
    cs = jnp.cumsum(x, axis=-1)
    cs = jnp.concatenate([jnp.zeros((B, C, 1), x.dtype), cs], axis=-1)   # (B, C, L+1)
    wsum = cs[:, :, T:T + k] - cs[:, :, :k]                              # (B, C, k)
    return (wsum * (1.0 / T)).reshape(B, C * k)                          # channel-major flatten


def _batch_tile(B):
    # Largest tile <= BB_MAX, but keep >= 2 grid steps when possible so the
    # "parallel" batch axis can be sharded across both v7x TensorCores.
    bp8 = ((B + 7) // 8) * 8
    if bp8 <= 8:
        return 8
    if bp8 <= 2 * BB_MAX:
        half = ((bp8 // 2 + 7) // 8) * 8
        return min(BB_MAX, max(8, half))
    return BB_MAX


def freqnet_forward(x, params):
    B, C, L = x.shape
    assert C == IN_C
    T = L - KSIZE + 1
    assert T == 293, "AvgPool1d(293)+Linear(1,1) implies conv output length 293 (L=300)"

    # Mean over T commutes with conv matmul / bias / BN affine (pool precedes
    # ReLU in the module) -> pool the input windows first.
    mpatch = window_means(x.astype(jnp.float32), KSIZE)              # (B, CK)

    BB = _batch_tile(B)
    BP = ((B + BB - 1) // BB) * BB
    if BP != B:
        mpatch = jnp.pad(mpatch, ((0, BP - B), (0, 0)))

    # Fold BN scale into the conv weight (one-time constant fold); keep only shift.
    scale = params["bn_gamma"] / jnp.sqrt(params["bn_rv"] + BN_EPS)          # (OUT_C,)
    shift = params["bn_beta"] + (params["conv_b"] - params["bn_rm"]) * scale # (OUT_C,)
    w2 = (params["conv_w"].reshape(OUT_C, CK) * scale[:, None]).T            # (CK, OUT_C)
    w2 = w2.astype(jnp.float32)
    shift = shift.reshape(1, OUT_C).astype(jnp.float32)

    lin = jnp.concatenate(
        [params["lin_w"].reshape(1), params["lin_b"].reshape(1)]
    ).astype(jnp.float32)                                                    # (2,)

    out = pl.pallas_call(
        freqnet_kernel,
        out_shape=jax.ShapeDtypeStruct((BP, OUT_C), jnp.float32),
        grid_spec=pltpu.PrefetchScalarGridSpec(
            num_scalar_prefetch=0,
            grid=(BP // BB,),
            in_specs=[
                pl.BlockSpec((BB, CK), lambda b: (b, 0)),
                pl.BlockSpec((CK, OUT_C), lambda b: (0, 0)),     # resident weight
                pl.BlockSpec((1, OUT_C), lambda b: (0, 0)),      # resident shift
                pl.BlockSpec(memory_space=pltpu.MemorySpace.SMEM),
            ],
            out_specs=pl.BlockSpec((BB, OUT_C), lambda b: (b, 0)),
        ),
        compiler_params=pltpu.CompilerParams(
            dimension_semantics=("parallel",),   # independent batch tiles (v7x: 2 TCs)
        ),
    )(mpatch, w2, shift, lin)

    if BP != B:
        out = out[:B]          # only trims batch padding; no channel slice copy
    return out


def reference_forward(x, params):
    # Pure-JAX reference matching the PyTorch module in eval mode.
    conv = jax.lax.conv_general_dilated(
        x, params["conv_w"], window_strides=(1,), padding="VALID",
        dimension_numbers=("NCH", "OIH", "NCH"))
    conv = conv + params["conv_b"][None, :, None]
    bn = (conv - params["bn_rm"][None, :, None]) / jnp.sqrt(
        params["bn_rv"][None, :, None] + BN_EPS
    ) * params["bn_gamma"][None, :, None] + params["bn_beta"][None, :, None]
    pooled = jnp.mean(bn, axis=2, keepdims=True)                     # AvgPool1d(293), T==293
    r = jnp.maximum(pooled, 0.0)
    y = r * params["lin_w"][0, 0] + params["lin_b"][0]
    return jax.nn.sigmoid(y.reshape(x.shape[0], -1))


def init_params(key):
    ks = jax.random.split(key, 8)
    return {
        "conv_w": 0.05 * jax.random.normal(ks[0], (OUT_C, IN_C, KSIZE), jnp.float32),
        "conv_b": 0.05 * jax.random.normal(ks[1], (OUT_C,), jnp.float32),
        "bn_gamma": 1.0 + 0.1 * jax.random.normal(ks[2], (OUT_C,), jnp.float32),
        "bn_beta": 0.1 * jax.random.normal(ks[3], (OUT_C,), jnp.float32),
        "bn_rm": 0.1 * jax.random.normal(ks[4], (OUT_C,), jnp.float32),
        "bn_rv": 0.5 + jnp.abs(jax.random.normal(ks[5], (OUT_C,), jnp.float32)) * 0.5,
        "lin_w": 0.5 * jax.random.normal(ks[6], (1, 1), jnp.float32),
        "lin_b": 0.1 * jax.random.normal(ks[7], (1,), jnp.float32),
    }


if __name__ == "__main__":
    key = jax.random.PRNGKey(0)
    k_x, k_p = jax.random.split(key)
    # Input length 300 is implied by AvgPool1d(293) after a kernel-8 VALID conv.
    B, L = 2, 300
    x = jax.random.normal(k_x, (B, IN_C, L), jnp.float32)
    params = init_params(k_p)

    out = freqnet_forward(x, params)
    out = jax.block_until_ready(out)

    ref = reference_forward(x, params)
    assert out.shape == (B, OUT_C), out.shape
    assert jnp.allclose(out, ref, rtol=1e-4, atol=2e-5), (
        float(jnp.max(jnp.abs(out - ref))))

    print("KERNEL_OK")
</pallas_src>

<mosaic_0001>
module attributes {stable_mosaic.version = 11 : i64} {
  func.func @freqnet_kernel(%arg0: i32, %arg1: memref<8x40xf32, #tpu.memory_space<vmem>>, %arg2: memref<40x1000xf32, #tpu.memory_space<vmem>>, %arg3: memref<1x1000xf32, #tpu.memory_space<vmem>>, %arg4: memref<2xf32, #tpu.memory_space<smem>>, %arg5: memref<8x1000xf32, #tpu.memory_space<vmem>>) attributes {dimension_semantics = [#tpu.dimension_semantics<parallel>], iteration_bounds = array<i64: 1>, scalar_prefetch = 0 : i64, scratch_operands = 0 : i64, tpu.core_type = #tpu.core_type<tc>, window_params = [{transform_indices = @transform_0, window_bounds = array<i64: 8, 40>}, {pipeline_mode = #tpu.pipeline_mode<synchronous>, transform_indices = @transform_1, window_bounds = array<i64: 40, 1000>}, {pipeline_mode = #tpu.pipeline_mode<synchronous>, transform_indices = @transform_2, window_bounds = array<i64: 1, 1000>}, {transform_indices = @transform_3, window_bounds = array<i64: 2>}, {transform_indices = @transform_4, window_bounds = array<i64: 8, 1000>}]} {
    %c0 = arith.constant 0 : index
    %c0_0 = arith.constant 0 : index
    %0 = vector.load %arg1[%c0, %c0_0] : memref<8x40xf32, #tpu.memory_space<vmem>>, vector<8x40xf32>
    %c0_1 = arith.constant 0 : index
    %c0_2 = arith.constant 0 : index
    %1 = vector.load %arg2[%c0_1, %c0_2] : memref<40x1000xf32, #tpu.memory_space<vmem>>, vector<40x1000xf32>
    %cst = arith.constant dense<0.000000e+00> : vector<8x1000xf32>
    %2 = tpu.matmul %0, %1, %cst {dimension_numbers = #tpu.dot_dimension_numbers<[1], [0], [0], [1], [0, 0, 1, 1], [], []>} : vector<8x40xf32>, vector<40x1000xf32>, vector<8x1000xf32> -> vector<8x1000xf32>
    %c0_3 = arith.constant 0 : index
    %c0_4 = arith.constant 0 : index
    %3 = vector.load %arg3[%c0_3, %c0_4] : memref<1x1000xf32, #tpu.memory_space<vmem>>, vector<1x1000xf32>
    %4 = vector.broadcast %3 : vector<1x1000xf32> to vector<8x1000xf32>
    %5 = arith.addf %2, %4 : vector<8x1000xf32>
    %cst_5 = arith.constant 0.000000e+00 : f32
    %6 = vector.broadcast %cst_5 : f32 to vector<8x1000xf32>
    %7 = arith.maximumf %5, %6 : vector<8x1000xf32>
    %c0_6 = arith.constant 0 : index
    %8 = memref.load %arg4[%c0_6] : memref<2xf32, #tpu.memory_space<smem>>
    %9 = vector.broadcast %8 : f32 to vector<8x1000xf32>
    %10 = arith.mulf %7, %9 : vector<8x1000xf32>
    %c1 = arith.constant 1 : index
    %11 = memref.load %arg4[%c1] : memref<2xf32, #tpu.memory_space<smem>>
    %12 = vector.broadcast %11 : f32 to vector<8x1000xf32>
    %13 = arith.addf %10, %12 : vector<8x1000xf32>
    %cst_7 = arith.constant 5.000000e-01 : f32
    %14 = vector.broadcast %cst_7 : f32 to vector<8x1000xf32>
    %15 = arith.mulf %14, %13 : vector<8x1000xf32>
    %16 = math.tanh %15 : vector<8x1000xf32>
    %cst_8 = arith.constant 5.000000e-01 : f32
    %17 = vector.broadcast %cst_8 : f32 to vector<8x1000xf32>
    %18 = arith.mulf %17, %16 : vector<8x1000xf32>
    %cst_9 = arith.constant 5.000000e-01 : f32
    %19 = vector.broadcast %cst_9 : f32 to vector<8x1000xf32>
    %20 = arith.addf %18, %19 : vector<8x1000xf32>
    %c0_10 = arith.constant 0 : index
    %c0_11 = arith.constant 0 : index
    %21 = vector.load %arg5[%c0_10, %c0_11] : memref<8x1000xf32, #tpu.memory_space<vmem>>, vector<8x1000xf32>
    tpu.vector_store %arg5[%c0_10, %c0_11], %20 {strides = array<i32>} : memref<8x1000xf32, #tpu.memory_space<vmem>>, vector<8x1000xf32>,
    return
  }
  func.func @transform_0(%arg0: i32) -> (i32, i32) {
    %c0_i32 = arith.constant 0 : i32
    %c0_i32_0 = arith.constant 0 : i32
    return %arg0, %c0_i32 : i32, i32
  }
  func.func @transform_1(%arg0: i32) -> (i32, i32) {
    %c0_i32 = arith.constant 0 : i32
    %c0_i32_0 = arith.constant 0 : i32
    %c0_i32_1 = arith.constant 0 : i32
    return %c0_i32, %c0_i32_0 : i32, i32
  }
  func.func @transform_2(%arg0: i32) -> (i32, i32) {
    %c0_i32 = arith.constant 0 : i32
    %c0_i32_0 = arith.constant 0 : i32
    %c0_i32_1 = arith.constant 0 : i32
    return %c0_i32, %c0_i32_0 : i32, i32
  }
  func.func @transform_3(%arg0: i32) -> i32 {
    %c0_i32 = arith.constant 0 : i32
    %c0_i32_0 = arith.constant 0 : i32
    return %c0_i32 : i32
  }
  func.func @transform_4(%arg0: i32) -> (i32, i32) {
    %c0_i32 = arith.constant 0 : i32
    %c0_i32_0 = arith.constant 0 : i32
    return %arg0, %c0_i32 : i32, i32
  }
}

</mosaic_0001>

<bundles_post_ra>
// kernel: tpu_custom_call.1
= control target key start
LH: loop header
LB: loop body
LE: loop exit
PB: predicated region body
PF: predicated region fallthrough
CT: control target
= control target key end

     0   :  { %9 = vsyncpa [#allocation3], 0  ;;  %s588_s0 = inlined_call_operand.hbm [shape: f32[8,40], index: 0, kind: input, shape index: {}]   ;;  %s589_s1 = inlined_call_operand.hbm [shape: f32[40,1000], index: 1, kind: input, shape index: {}]   ;;  %s590_s2 = inlined_call_operand.hbm [shape: f32[1,1000], index: 2, kind: input, shape index: {}]   ;;  %s591_s3 = inlined_call_operand.vmem [shape: f32[2], index: 3, kind: input, shape index: {}]   ;;  %s592_s4 = inlined_call_operand.hbm [shape: f32[8,1000], index: 4, kind: output, shape index: {}]  }
   0x1   :  { %10 = vsyncpa [#allocation7], 0 }
   0x2   :  { %11 = vsyncpa [#allocation5], 0  ;;  %s28_s17 = sshll.u32 %s589_s1, 4  ;;  %s29_s17 = int_to_ptr.hbm [resolvable:$true] %s28_s17 }
   0x3   :  { %12 = vsyncpa [#allocation4], 0  ;;  %s533_s18 = smov [#allocation6]   ;;  %s18_s22 = sshll.u32 %s588_s0, 4  ;;  %s19_s22 = int_to_ptr.hbm [resolvable:$true] %s18_s22 }
   0x4   :  { %s30_s19 = sshll.u32 %s533_s18, 4  ;;  %s534_s23 = smov 1024   ;;  %s31_s19 = int_to_ptr.vmem [resolvable:$true] %s30_s19 }
   0x5   :  { %s535_s24 = smov 64   ;;  %s536_s25 = smov [#allocation2]  }
   0x6   :  { %36 = dma.hbm_to_vmem [thread:$0]  %s29_s17, 5120, %s31_s19, [#allocation7], %s534_s23, %s534_s23, %s535_s24  }
   0x7   :  { %s20_s26 = sshll.u32 %s536_s25, 4  ;;  %s42_s29 = sshll.u32 %s590_s2, 4  ;;  %s21_s26 = int_to_ptr.vmem [resolvable:$true] %s20_s26  ;;  %s43_s29 = int_to_ptr.hbm [resolvable:$true] %s42_s29 }
   0x8   :  { %23 = dma.hbm_to_vmem [thread:$0]  %s19_s22, 128, %s21_s26, [#allocation3]  }
   0x9   :  { %s53_s5 = sshll.u32 %s591_s3, 4  ;;  %s537_s6 = smov [#allocation8]   ;;  %s54_s5 = int_to_ptr.vmem [resolvable:$true] %s53_s5 }
   0xa   :  { %s44_s7 = sshll.u32 %s537_s6, 4  ;;  %s538_s0 = smov [#allocation9]   ;;  %s45_s7 = int_to_ptr.vmem [resolvable:$true] %s44_s7 }
   0xb   :  { %47 = dma.hbm_to_vmem [thread:$0]  %s43_s29, 128, %s45_s7, [#allocation7]  }
   0xc   :  { %56 = dma.vmem_to_smem %s54_s5, 16, %s538_s0, [#allocation5]  }
   0xd   :  { %525 = dma.done.wait [#allocation3], 128  }
   0xe   :  { %526 = vsyncadd [#allocation3], 4294967168 }
   0xf   :  { %527 = dma.done.wait [#allocation7], 5248  }
  0x10   :  { %528 = vsyncadd [#allocation7], 4294962048 }
  0x11   :  { %529 = dma.done.wait [#allocation5], 16  }
  0x12   :  { %530 = vsyncadd [#allocation5], 4294967280 }
  0x13   :  { %73 = sfence }
  0x14   :  { %v109_v0 = vld [vmem:[#allocation6 + $0x110] sm:$0xff]  ;;  %v110_v1 = vld [vmem:[#allocation6 + $0x118] sm:$0xff]  ;;  %v107_v6 = vld [vmem:[#allocation6 + $0x100] sm:$0xff]  ;;  %vm133_vm0 = vcmask 326656   ;;  %s305_s2 = sld [smem:[#allocation9]]  ;;  %s539_s8 = smov [#allocation10]  }
  0x15   :  { %v101_v2 = vld [vmem:[#allocation6 + $0xd0] sm:$0xff]  ;;  %188 = vmatpush.msra.mxu2 %v109_v0  ;;  %208 = vmatpush.msra.mxu3 %v110_v1  ;;  %v102_v3 = vld [vmem:[#allocation6 + $0xd8] sm:$0xff]  ;;  %v108_v7 = vld [vmem:[#allocation6 + $0x108] sm:$0xff]  ;;  %s393_s3 = sld [smem:[#allocation9 + $0x1]]  ;;  %s371_s9 = sshll.u32 %s539_s8, 4  ;;  %vm364_vm1 = vcmask 850944   ;;  %s372_s9 = int_to_ptr.vmem [resolvable:$true] %s371_s9 }
  0x16   :  { %v93_v4 = vld [vmem:[#allocation6 + $0x90] sm:$0xff]  ;;  %v94_v5 = vld [vmem:[#allocation6 + $0x98] sm:$0xff]  ;;  %v99_v8 = vld [vmem:[#allocation6 + $0xc0] sm:$0xff]  ;;  %148 = vmatpush.msra.mxu0 %v107_v6  ;;  %168 = vmatpush.msra.mxu1 %v108_v7  ;;  %s373_s12 = sshll.u32 %s592_s4, 4  ;;  %s374_s12 = int_to_ptr.hbm [resolvable:$true] %s373_s12 }
  0x17   :  { %189 = vmatpush.msra.mxu2 %v101_v2  ;;  %209 = vmatpush.msra.mxu3 %v102_v3  ;;  %v100_v9 = vld [vmem:[#allocation6 + $0xc8] sm:$0xff]  ;;  %v85_v10 = vld [vmem:[#allocation6 + $0x50] sm:$0xff]  ;;  %v86_v11 = vld [vmem:[#allocation6 + $0x58] sm:$0xff] }
  0x18   :  { %v91_v12 = vld [vmem:[#allocation6 + $0x80] sm:$0xff]  ;;  %v92_v13 = vld [vmem:[#allocation6 + $0x88] sm:$0xff]  ;;  %149 = vmatpush.msra.mxu0 %v99_v8  ;;  %169 = vmatpush.msra.mxu1 %v100_v9  ;;  %v77_v14 = vld [vmem:[#allocation6 + $0x10] sm:$0xff] }
  0x19   :  { %190 = vmatpush.msra.mxu2 %v93_v4  ;;  %210 = vmatpush.msra.mxu3 %v94_v5  ;;  %v78_v15 = vld [vmem:[#allocation6 + $0x18] sm:$0xff]  ;;  %v113_v16 = vld [vmem:[#allocation6 + $0x130] sm:$0xff]  ;;  %v83_v21 = vld [vmem:[#allocation6 + $0x40] sm:$0xff] }
  0x1a   :  { %v114_v17 = vld [vmem:[#allocation6 + $0x138] sm:$0xff]  ;;  %150 = vmatpush.msra.mxu0 %v91_v12  ;;  %170 = vmatpush.msra.mxu1 %v92_v13  ;;  %v105_v19 = vld [vmem:[#allocation6 + $0xf0] sm:$0xff]  ;;  %v84_v22 = vld [vmem:[#allocation6 + $0x48] sm:$0xff]  ;;  %v306_v53 = vstv %s305_s2 }
  0x1b   :  { %191 = vmatpush.msra.mxu2 %v85_v10  ;;  %211 = vmatpush.msra.mxu3 %v86_v11  ;;  %v74_v18 = vld [vmem:[#allocation2] sm:$0xff]  ;;  %v97_v23 = vld [vmem:[#allocation6 + $0xb0] sm:$0xff]  ;;  %v75_v25 = vld [vmem:[#allocation6] sm:$0xff]  ;;  %v316_v58 = vstv %s393_s3 }
  0x1c   :  { %v106_v20 = vld [vmem:[#allocation6 + $0xf8] sm:$0xff]  ;;  %v76_v26 = vld [vmem:[#allocation6 + $0x8] sm:$0xff]  ;;  %151 = vmatpush.msra.mxu0 %v83_v21  ;;  %171 = vmatpush.msra.mxu1 %v84_v22  ;;  %v111_v27 = vld [vmem:[#allocation6 + $0x120] sm:$0xff] }
  0x1d   :  { %192 = vmatpush.msra.mxu2 %v77_v14  ;;  %212 = vmatpush.msra.mxu3 %v78_v15  ;;  %v98_v24 = vld [vmem:[#allocation6 + $0xb8] sm:$0xff]  ;;  %v112_v28 = vld [vmem:[#allocation6 + $0x128] sm:$0xff]  ;;  %v89_v29 = vld [vmem:[#allocation6 + $0x70] sm:$0xff] }
  0x1e   :  { %387 = vmatmul.msk.f32.vlgmr.msra.gmra.mxu2 %vm133_vm0, %v74_v18  ;;  %388 = vmatmul.msk.f32.vlgmr.msra.gmra.mxu3 %vm133_vm0, %v74_v18  ;;  %v90_v30 = vld [vmem:[#allocation6 + $0x78] sm:$0xff]  ;;  %v103_v31 = vld [vmem:[#allocation6 + $0xe0] sm:$0xff]  ;;  %v104_v32 = vld [vmem:[#allocation6 + $0xe8] sm:$0xff] }
  0x1f   :  { %268 = vmatpush.msrb.mxu2 %v113_v16  ;;  %288 = vmatpush.msrb.mxu3 %v114_v17  ;;  %v81_v33 = vld [vmem:[#allocation6 + $0x30] sm:$0xff]  ;;  %v82_v34 = vld [vmem:[#allocation6 + $0x38] sm:$0xff]  ;;  %v95_v35 = vld [vmem:[#allocation6 + $0xa0] sm:$0xff] }
  0x20   :  { %152 = vmatpush.msra.mxu0 %v75_v25  ;;  %172 = vmatpush.msra.mxu1 %v76_v26  ;;  %v96_v36 = vld [vmem:[#allocation6 + $0xa8] sm:$0xff]  ;;  %v87_v37 = vld [vmem:[#allocation6 + $0x60] sm:$0xff] }
  0x21   :  { %269 = vmatpush.msrb.mxu2 %v105_v19  ;;  %289 = vmatpush.msrb.mxu3 %v106_v20  ;;  %v88_v38 = vld [vmem:[#allocation6 + $0x68] sm:$0xff]  ;;  %v79_v39 = vld [vmem:[#allocation6 + $0x20] sm:$0xff] }
  0x22   :  { %228 = vmatpush.msrb.mxu0 %v111_v27  ;;  %248 = vmatpush.msrb.mxu1 %v112_v28  ;;  %v80_v40 = vld [vmem:[#allocation6 + $0x28] sm:$0xff]  ;;  %v115_v41 = vld [vmem:[#allocation8] sm:$0xff] }
  0x23   :  { %270 = vmatpush.msrb.mxu2 %v97_v23  ;;  %290 = vmatpush.msrb.mxu3 %v98_v24  ;;  %v119_v42 = vperm.slane %v115_v41, 2  ;;  %v120_v43 = vperm.slane %v115_v41, 3  ;;  %v117_v44 = vperm.slane %v115_v41, 0  ;;  %v118_v45 = vperm.slane %v115_v41, 1 }
  0x24   :  { %385 = vmatmul.msk.f32.vlgmr.msra.gmra.mxu0 %vm133_vm0, %v74_v18  ;;  %386 = vmatmul.msk.f32.vlgmr.msra.gmra.mxu1 %vm133_vm0, %v74_v18  ;;  %v121_v2 = vperm.slane %v115_v41, 4  ;;  %v122_v3 = vperm.slane %v115_v41, 5  ;;  %v123_v6 = vperm.slane %v115_v41, 6  ;;  %v124_v7 = vperm.slane %v115_v41, 7 }
  0x25   :  { %271 = vmatpush.msrb.mxu2 %v89_v29  ;;  %291 = vmatpush.msrb.mxu3 %v90_v30 }
  0x26   :  { %229 = vmatpush.msrb.mxu0 %v103_v31  ;;  %249 = vmatpush.msrb.mxu1 %v104_v32 }
  0x27   :  { %272 = vmatpush.msrb.mxu2 %v81_v33  ;;  %292 = vmatpush.msrb.mxu3 %v82_v34 }
  0x28   :  { %391 = vmatmul.msk.f32.vlgmr.msrb.gmra.mxu2 %vm133_vm0, %v74_v18  ;;  %392 = vmatmul.msk.f32.vlgmr.msrb.gmra.mxu3 %vm133_vm0, %v74_v18 }
  0x29   :  { %230 = vmatpush.msrb.mxu0 %v95_v35  ;;  %250 = vmatpush.msrb.mxu1 %v96_v36 }
  0x2b   :  { %231 = vmatpush.msrb.mxu0 %v87_v37  ;;  %251 = vmatpush.msrb.mxu1 %v88_v38 }
  0x2d   :  { %232 = vmatpush.msrb.mxu0 %v79_v39  ;;  %252 = vmatpush.msrb.mxu1 %v80_v40 }
  0x2e   :  { %389 = vmatmul.msk.f32.vlgmr.msrb.gmra.mxu0 %vm133_vm0, %v74_v18  ;;  %390 = vmatmul.msk.f32.vlgmr.msrb.gmra.mxu1 %vm133_vm0, %v74_v18 }
  0xa1   :  { %v194_v46 = vpop.f32.mrf.mxu2  ;;  %v214_v47 = vpop.f32.mrf.mxu3 }
  0xa2   :  { %v154_v48 = vpop.f32.mrf.mxu0  ;;  %v174_v49 = vpop.f32.mrf.mxu1  ;;  %v195_v50 = vadd.f32 %v194_v46, %v119_v42  ;;  %v215_v51 = vadd.f32 %v214_v47, %v120_v43 }
  0xa3   :  { %v155_v52 = vadd.f32 %v154_v48, %v117_v44  ;;  %v175_v54 = vadd.f32 %v174_v49, %v118_v45 }
  0xa4   :  { %v299_v55 = vmax.f32 %v195_v50, 0.0  ;;  %v300_v56 = vmax.f32 %v215_v51, 0.0 }
  0xa5   :  { %v297_v57 = vmax.f32 %v155_v52, 0.0  ;;  %v298_v59 = vmax.f32 %v175_v54, 0.0 }
  0xa6   :  { %v309_v60 = vmul.f32 %v306_v53, %v299_v55  ;;  %v310_v61 = vmul.f32 %v306_v53, %v300_v56 }
  0xa7   :  { %v307_v62 = vmul.f32 %v306_v53, %v297_v57  ;;  %v308_v63 = vmul.f32 %v306_v53, %v298_v59 }
  0xa8   :  { %v319_v0 = vadd.f32 %v316_v58, %v309_v60  ;;  %v320_v1 = vadd.f32 %v316_v58, %v310_v61 }
  0xa9   :  { %v317_v4 = vadd.f32 %v316_v58, %v307_v62  ;;  %v318_v5 = vadd.f32 %v316_v58, %v308_v63 }
  0xaa   :  { %v327_v8 = vmul.f32 0.5, %v319_v0  ;;  %v328_v11 = vmul.f32 0.5, %v320_v1 }
  0xab   :  { %v325_v9 = vmul.f32 0.5, %v317_v4  ;;  %v326_v10 = vmul.f32 0.5, %v318_v5  ;;  %v234_v12 = vpop.f32.mrf.mxu0  ;;  %v254_v13 = vpop.f32.mrf.mxu1 }
  0xac   :  { %401 = vtanh.f32 %v327_v8  ;;  %v235_v14 = vadd.f32 %v234_v12, %v121_v2  ;;  %v255_v15 = vadd.f32 %v254_v13, %v122_v3  ;;  %v274_v16 = vpop.f32.mrf.mxu2  ;;  %v294_v17 = vpop.f32.mrf.mxu3 }
  0xad   :  { %403 = vtanh.f32 %v325_v9  ;;  %v275_v18 = vadd.f32 %v274_v16, %v123_v6  ;;  %v295_v19 = vadd.f32 %v294_v17, %v124_v7 }
  0xae   :  { %405 = vtanh.f32 %v326_v10  ;;  %v301_v20 = vmax.f32 %v235_v14, 0.0  ;;  %v302_v21 = vmax.f32 %v255_v15, 0.0 }
  0xaf   :  { %407 = vtanh.f32 %v328_v11  ;;  %v303_v22 = vmax.f32 %v275_v18, 0.0  ;;  %v304_v23 = vmax.f32 %v295_v19, 0.0 }
  0xb0   :  { %v311_v24 = vmul.f32 %v306_v53, %v301_v20  ;;  %v312_v25 = vmul.f32 %v306_v53, %v302_v21 }
  0xb1   :  { %v313_v26 = vmul.f32 %v306_v53, %v303_v22  ;;  %v314_v27 = vmul.f32 %v306_v53, %v304_v23 }
  0xb2   :  { %v402_v28 = vpop.eup %401  ;;  %v321_v29 = vadd.f32 %v316_v58, %v311_v24  ;;  %v322_v30 = vadd.f32 %v316_v58, %v312_v25 }
  0xb3   :  { %v404_v31 = vpop.eup %403  ;;  %v343_v32 = vmul.f32 0.5, %v402_v28  ;;  %v323_v33 = vadd.f32 %v316_v58, %v313_v26  ;;  %v324_v34 = vadd.f32 %v316_v58, %v314_v27 }
  0xb4   :  { %v406_v35 = vpop.eup %405  ;;  %v341_v36 = vmul.f32 0.5, %v404_v31  ;;  %v329_v37 = vmul.f32 0.5, %v321_v29  ;;  %v330_v38 = vmul.f32 0.5, %v322_v30 }
  0xb5   :  { %v408_v39 = vpop.eup %407  ;;  %v342_v40 = vmul.f32 0.5, %v406_v35  ;;  %v351_v41 = vadd.f32 0.5, %v343_v32  ;;  %v331_v42 = vmul.f32 0.5, %v323_v33  ;;  %v332_v43 = vmul.f32 0.5, %v324_v34 }
  0xb6   :  { %v349_v44 = vadd.f32 0.5, %v341_v36  ;;  %v344_v45 = vmul.f32 0.5, %v408_v39  ;;  %409 = vtanh.f32 %v329_v37 }
  0xb7   :  { %v350_v46 = vadd.f32 0.5, %v342_v40  ;;  %359 = vst [vmem:[#allocation10 + $0x10] sm:$0xff] %v351_v41  ;;  %411 = vtanh.f32 %v330_v38 }
  0xb8   :  { %357 = vst [vmem:[#allocation10] sm:$0xff] %v349_v44  ;;  %v352_v47 = vadd.f32 0.5, %v344_v45  ;;  %413 = vtanh.f32 %v331_v42 }
  0xb9   :  { %358 = vst [vmem:[#allocation10 + $0x8] sm:$0xff] %v350_v46  ;;  %415 = vtanh.f32 %v332_v43 }
  0xba   :  { %360 = vst [vmem:[#allocation10 + $0x18] sm:$0xff] %v352_v47 }
  0xbc   :  { %v410_v48 = vpop.eup %409 }
  0xbd   :  { %v412_v49 = vpop.eup %411  ;;  %v345_v50 = vmul.f32 0.5, %v410_v48 }
  0xbe   :  { %v414_v51 = vpop.eup %413  ;;  %v346_v52 = vmul.f32 0.5, %v412_v49 }
  0xbf   :  { %v416_v53 = vpop.eup %415  ;;  %v353_v54 = vadd.f32 0.5, %v345_v50  ;;  %v347_v55 = vmul.f32 0.5, %v414_v51 }
  0xc0   :  { %v354_v56 = vadd.f32 0.5, %v346_v52  ;;  %v348_v57 = vmul.f32 0.5, %v416_v53 }
  0xc1   :  { %361 = vst [vmem:[#allocation10 + $0x20] sm:$0xff] %v353_v54  ;;  %v355_v58 = vadd.f32 0.5, %v347_v55 }
  0xc2   :  { %362 = vst [vmem:[#allocation10 + $0x28] sm:$0xff] %v354_v56  ;;  %v356_v59 = vadd.f32 0.5, %v348_v57 }
  0xc3   :  { %363 = vst [vmem:[#allocation10 + $0x30] sm:$0xff] %v355_v58 }
  0xc4   :  { %365 = vst.msk [vmem:[#allocation10 + $0x38] sm:$0xff] %vm364_vm1, %v356_v59 }
  0xc5   :  { %376 = dma.vmem_to_hbm [thread:$0]  %s372_s9, 1024, %s374_s12, [#allocation4]  }
  0xc6   :  { %531 = dma.done.wait [#allocation4], 1024  }
  0xc7   :  { %532 = vsyncadd [#allocation4], 4294966272 }
  0xc8   :  { %381 = vsyncpa [#allocation3], 1 }
  0xc9   :  { %382 = vsyncpa [#allocation7], 1 }
  0xca   :  { %383 = vsyncpa [#allocation4], 1 }
  0xcb   :  { %384 = vsyncpa [#allocation5], 1 }

</bundles_post_ra>
